<compile_context>
chip_gen: v6e
topology: v6e:2x2x1
jax: 0.10.0
libtpu: 0.0.40
codegen_flags: <defaults>
</compile_context>

<pallas_src>
import functools

import jax
import jax.numpy as jnp
from jax import lax
from jax.experimental import pallas as pl
from jax.experimental.pallas import tpu as pltpu

_LANE = 128
_SUBLANE = 8
_MSE_WIDTH = 512          # lane-dense width for the elementwise MSE path
_MSE_MAX_ROWS = 256       # rows per MSE tile (256x512xf32 = 512 KiB / buffer)
_VMEM_LIMIT = 32 * 1024 * 1024
_TK_BUDGET = 20 * 1024 * 1024


def _round_up(x, m):
    return ((x + m - 1) // m) * m


def _choose_tk(m_pad, k, elem_bytes):
    """Pick a K tile (multiple of 128) that fits double-buffered in VMEM."""
    fixed = 4 * m_pad * m_pad * 4           # f32 accumulator + target (x2 buf)
    per_col = 2 * m_pad * elem_bytes        # double-buffered feature column
    avail = max(_TK_BUDGET - fixed, _LANE * per_col)
    max_tk = (avail // per_col) // _LANE * _LANE
    k_ceil = _round_up(k, _LANE)
    return max(_LANE, min(k_ceil, 2048, max_tk))


def _compiler_params(grid_rank):
    return pltpu.CompilerParams(
        dimension_semantics=("arbitrary",) * grid_rank,
        vmem_limit_bytes=_VMEM_LIMIT,
    )


def _pad2d(x, rows, cols):
    r, c = x.shape
    if r == rows and c == cols:
        return x
    return jnp.pad(x, ((0, rows - r), (0, cols - c)))


def _prep_features(feat_nchw, dtype):
    """NCHW -> zero-padded (m_pad, k_pad) feature matrix + tiling info."""
    a, b, c, d = feat_nchw.shape
    m, k = a * b, c * d
    f = feat_nchw.reshape(m, k).astype(dtype)
    m_pad = _round_up(m, _SUBLANE)
    tk = _choose_tk(m_pad, k, jnp.dtype(dtype).itemsize)
    k_pad = _round_up(k, tk)
    f = _pad2d(f, m_pad, k_pad)
    return f, m, m_pad, k_pad, tk


# ----------------------------- Pallas kernels -------------------------------

def _mse_kernel(x_ref, y_ref, o_ref, *, inv_n):
    """Accumulate sum((x-y)^2) * inv_n into the resident (1,1) output block."""
    i = pl.program_id(0)

    @pl.when(i == 0)
    def _init():
        o_ref[...] = jnp.zeros_like(o_ref)

    d = x_ref[...].astype(jnp.float32) - y_ref[...].astype(jnp.float32)
    o_ref[...] = o_ref[...] + jnp.sum(d * d) * jnp.float32(inv_n)


def _gram_kernel(f_ref, g_ref, *, scale):
    """K-gridded G = (F @ F.T) * scale; output block is the accumulator."""
    k = pl.program_id(0)

    @pl.when(k == 0)
    def _init():
        g_ref[...] = jnp.zeros_like(g_ref)

    f = f_ref[...]
    g_ref[...] += lax.dot_general(
        f, f, (((1,), (1,)), ((), ())), preferred_element_type=jnp.float32)

    @pl.when(k == pl.num_programs(0) - 1)
    def _finalize():
        g_ref[...] = g_ref[...] * jnp.float32(scale)


def _gram_mse_kernel(f_ref, gt_ref, o_ref, acc_ref, *, scale, inv_msq):
    """Fused: accumulate F @ F.T over K, then MSE against the gram target."""
    k = pl.program_id(0)

    @pl.when(k == 0)
    def _init():
        acc_ref[...] = jnp.zeros_like(acc_ref)
        o_ref[...] = jnp.zeros_like(o_ref)

    f = f_ref[...]
    acc_ref[...] += lax.dot_general(
        f, f, (((1,), (1,)), ((), ())), preferred_element_type=jnp.float32)

    @pl.when(k == pl.num_programs(0) - 1)
    def _finalize():
        diff = acc_ref[...] * jnp.float32(scale) - gt_ref[...].astype(jnp.float32)
        o_ref[0, 0] = jnp.sum(diff * diff) * jnp.float32(inv_msq)


# ----------------------------- wrappers --------------------------------------

def mse(x, y):
    """MSE of two equal-shape arrays; row-gridded, resident scalar accumulator."""
    assert x.shape == y.shape
    n = int(x.size)
    rows = -(-n // _MSE_WIDTH)
    tr = min(_round_up(rows, _SUBLANE), _MSE_MAX_ROWS)
    rows_pad = _round_up(rows, tr)
    total = rows_pad * _MSE_WIDTH
    xf = jnp.pad(x.reshape(-1), (0, total - n)).reshape(rows_pad, _MSE_WIDTH)
    yf = jnp.pad(y.reshape(-1), (0, total - n)).reshape(rows_pad, _MSE_WIDTH)
    grid = (rows_pad // tr,)
    kern = functools.partial(_mse_kernel, inv_n=1.0 / float(n))
    out = pl.pallas_call(
        kern,
        out_shape=jax.ShapeDtypeStruct((1, 1), jnp.float32),
        grid_spec=pltpu.PrefetchScalarGridSpec(
            num_scalar_prefetch=0,
            grid=grid,
            in_specs=[pl.BlockSpec((tr, _MSE_WIDTH), lambda i: (i, 0)),
                      pl.BlockSpec((tr, _MSE_WIDTH), lambda i: (i, 0))],
            out_specs=pl.BlockSpec((1, 1), lambda i: (0, 0)),
        ),
        compiler_params=_compiler_params(1),
    )(xf, yf)
    return out[0, 0]


def gram_matrix(feat_nchw, *, mxu_dtype=None, keep_padded=False):
    """Pallas version of the reference gram_matrix (input is NCHW)."""
    dtype = mxu_dtype or feat_nchw.dtype
    a, b, c, d = feat_nchw.shape
    f, m, m_pad, k_pad, tk = _prep_features(feat_nchw, dtype)
    scale = 1.0 / float(a * b * c * d)
    kern = functools.partial(_gram_kernel, scale=scale)
    g = pl.pallas_call(
        kern,
        out_shape=jax.ShapeDtypeStruct((m_pad, m_pad), jnp.float32),
        grid_spec=pltpu.PrefetchScalarGridSpec(
            num_scalar_prefetch=0,
            grid=(k_pad // tk,),
            in_specs=[pl.BlockSpec((m_pad, tk), lambda kk: (0, kk))],
            out_specs=pl.BlockSpec((m_pad, m_pad), lambda kk: (0, 0)),
        ),
        compiler_params=_compiler_params(1),
    )(f)
    return g if keep_padded else g[:m, :m]


def gram_mse_loss(feat_nchw, gram_target_padded, *, mxu_dtype=None):
    """Fused gram(feat) + MSE(gram, target) -> scalar, no (m,m) HBM round trip."""
    dtype = mxu_dtype or feat_nchw.dtype
    a, b, c, d = feat_nchw.shape
    f, m, m_pad, k_pad, tk = _prep_features(feat_nchw, dtype)
    assert gram_target_padded.shape == (m_pad, m_pad)
    scale = 1.0 / float(a * b * c * d)
    inv_msq = 1.0 / float(m * m)
    kern = functools.partial(_gram_mse_kernel, scale=scale, inv_msq=inv_msq)
    out = pl.pallas_call(
        kern,
        out_shape=jax.ShapeDtypeStruct((1, 1), jnp.float32),
        grid_spec=pltpu.PrefetchScalarGridSpec(
            num_scalar_prefetch=0,
            grid=(k_pad // tk,),
            in_specs=[
                pl.BlockSpec((m_pad, tk), lambda kk: (0, kk)),
                pl.BlockSpec((m_pad, m_pad), lambda kk: (0, 0)),
            ],
            out_specs=pl.BlockSpec((1, 1), lambda kk: (0, 0)),
            scratch_shapes=[pltpu.VMEM((m_pad, m_pad), jnp.float32)],
        ),
        compiler_params=_compiler_params(1),
    )(f, gram_target_padded)
    return out[0, 0]


class Reconstructionloss:
    """JAX/Pallas equivalent of the PyTorch Reconstructionloss module."""

    def __init__(self, style_target, content_target, alpha, beta, mxu_dtype=None):
        # ContentLoss target (detach == just store the array).
        self.content_target = jnp.asarray(content_target)
        # StyleLoss targets: precomputed (padded) gram matrices, computed once
        # with the same tiled gram kernel (detached).
        self.mxu_dtype = mxu_dtype
        self.gram_targets = [
            gram_matrix(t, mxu_dtype=mxu_dtype, keep_padded=True)
            for t in style_target
        ]
        self.alpha = alpha
        self.beta = beta

    def __call__(self, style_input, content_input):
        # Content loss: MSE(content_input, content_target).
        closs = mse(content_input, self.content_target)
        # Style loss: sum_i MSE(gram(style_input[i]), gram_target[i]) — fused.
        sloss = jnp.float32(0.0)
        for x, gt in zip(style_input, self.gram_targets):
            sloss = sloss + gram_mse_loss(x, gt, mxu_dtype=self.mxu_dtype)
        return self.alpha * closs + self.beta * sloss


# ----------------------------- reference (plain JAX) -------------------------

def _ref_gram(x):
    a, b, c, d = x.shape
    f = x.reshape(a * b, c * d).astype(jnp.float32)
    return (f @ f.T) / (a * b * c * d)


def _ref_loss(style_target, content_target, alpha, beta, style_input, content_input):
    closs = jnp.mean((content_input.astype(jnp.float32)
                      - content_target.astype(jnp.float32)) ** 2)
    sloss = 0.0
    for x, t in zip(style_input, style_target):
        sloss = sloss + jnp.mean((_ref_gram(x) - _ref_gram(t)) ** 2)
    return alpha * closs + beta * sloss


# ----------------------------- main -------------------------------------------

if __name__ == "__main__":
    key = jax.random.PRNGKey(0)
    keys = jax.random.split(key, 8)

    # Small, deterministic synthetic "feature maps" (NCHW like the PyTorch module).
    style_shapes = [(1, 4, 8, 8), (1, 8, 8, 8), (1, 16, 4, 4)]
    content_shape = (1, 8, 8, 8)

    style_target = [jax.random.normal(keys[i], s, dtype=jnp.float32)
                    for i, s in enumerate(style_shapes)]
    style_input = [jax.random.normal(keys[3 + i], s, dtype=jnp.float32)
                   for i, s in enumerate(style_shapes)]
    content_target = jax.random.normal(keys[6], content_shape, dtype=jnp.float32)
    content_input = jax.random.normal(keys[7], content_shape, dtype=jnp.float32)

    alpha, beta = 1.0, 1e3

    # Default f32 MXU path (pass mxu_dtype=jnp.bfloat16 on v6e/v7x for ~2x gram
    # throughput when the loss precision budget allows).
    loss_mod = Reconstructionloss(style_target, content_target, alpha, beta)
    loss = loss_mod(style_input, content_input)
    loss = jax.block_until_ready(loss)

    ref = jax.block_until_ready(
        _ref_loss(style_target, content_target, alpha, beta,
                  style_input, content_input))

    assert jnp.allclose(loss, ref, rtol=1e-4, atol=1e-5), (loss, ref)
    print("KERNEL_OK")
</pallas_src>

<mosaic_0001>
module attributes {stable_mosaic.version = 11 : i64} {
  func.func @_gram_kernel(%arg0: i32, %arg1: memref<8x128xf32, #tpu.memory_space<vmem>>, %arg2: memref<8x8xf32, #tpu.memory_space<vmem>>) attributes {dimension_semantics = [#tpu.dimension_semantics<arbitrary>], iteration_bounds = array<i64: 1>, scalar_prefetch = 0 : i64, scratch_operands = 0 : i64, tpu.core_type = #tpu.core_type<tc>, window_params = [{transform_indices = @transform_0, window_bounds = array<i64: 8, 128>}, {pipeline_mode = #tpu.pipeline_mode<synchronous>, transform_indices = @transform_1, window_bounds = array<i64: 8, 8>}]} {
    %c0_i32 = arith.constant 0 : i32
    %0 = arith.cmpi eq, %arg0, %c0_i32 : i32
    %1 = arith.extui %0 : i1 to i32
    %c0_i32_0 = arith.constant 0 : i32
    %2 = arith.cmpi ne, %1, %c0_i32_0 : i32
    scf.if %2 {
      %cst_8 = arith.constant 0.000000e+00 : f32
      %11 = vector.broadcast %cst_8 : f32 to vector<8x8xf32>
      %c0_9 = arith.constant 0 : index
      %c0_10 = arith.constant 0 : index
      %12 = vector.load %arg2[%c0_9, %c0_10] : memref<8x8xf32, #tpu.memory_space<vmem>>, vector<8x8xf32>
      tpu.vector_store %arg2[%c0_9, %c0_10], %11 {strides = array<i32>} : memref<8x8xf32, #tpu.memory_space<vmem>>, vector<8x8xf32>,
    } else {
    }
    %c0 = arith.constant 0 : index
    %c0_1 = arith.constant 0 : index
    %3 = vector.load %arg1[%c0, %c0_1] : memref<8x128xf32, #tpu.memory_space<vmem>>, vector<8x128xf32>
    %c0_2 = arith.constant 0 : index
    %c0_3 = arith.constant 0 : index
    %4 = vector.load %arg2[%c0_2, %c0_3] : memref<8x8xf32, #tpu.memory_space<vmem>>, vector<8x8xf32>
    %cst = arith.constant dense<0.000000e+00> : vector<8x8xf32>
    %5 = tpu.matmul %3, %3, %cst {dimension_numbers = #tpu.dot_dimension_numbers<[1], [1], [0], [0], [0, 0, 1, 0], [], []>} : vector<8x128xf32>, vector<8x128xf32>, vector<8x8xf32> -> vector<8x8xf32>
    %6 = arith.addf %4, %5 : vector<8x8xf32>
    %c0_4 = arith.constant 0 : index
    %c0_5 = arith.constant 0 : index
    %7 = vector.load %arg2[%c0_4, %c0_5] : memref<8x8xf32, #tpu.memory_space<vmem>>, vector<8x8xf32>
    tpu.vector_store %arg2[%c0_4, %c0_5], %6 {strides = array<i32>} : memref<8x8xf32, #tpu.memory_space<vmem>>, vector<8x8xf32>,
    %c0_i32_6 = arith.constant 0 : i32
    %8 = arith.cmpi eq, %arg0, %c0_i32_6 : i32
    %9 = arith.extui %8 : i1 to i32
    %c0_i32_7 = arith.constant 0 : i32
    %10 = arith.cmpi ne, %9, %c0_i32_7 : i32
    scf.if %10 {
      %c0_8 = arith.constant 0 : index
      %c0_9 = arith.constant 0 : index
      %11 = vector.load %arg2[%c0_8, %c0_9] : memref<8x8xf32, #tpu.memory_space<vmem>>, vector<8x8xf32>
      %cst_10 = arith.constant 3.906250e-03 : f32
      %12 = vector.broadcast %cst_10 : f32 to vector<8x8xf32>
      %13 = arith.mulf %11, %12 : vector<8x8xf32>
      %c0_11 = arith.constant 0 : index
      %c0_12 = arith.constant 0 : index
      %14 = vector.load %arg2[%c0_11, %c0_12] : memref<8x8xf32, #tpu.memory_space<vmem>>, vector<8x8xf32>
      tpu.vector_store %arg2[%c0_11, %c0_12], %13 {strides = array<i32>} : memref<8x8xf32, #tpu.memory_space<vmem>>, vector<8x8xf32>,
    } else {
    }
    return
  }
  func.func @transform_0(%arg0: i32) -> (i32, i32) {
    %c0_i32 = arith.constant 0 : i32
    %c0_i32_0 = arith.constant 0 : i32
    return %c0_i32, %arg0 : i32, i32
  }
  func.func @transform_1(%arg0: i32) -> (i32, i32) {
    %c0_i32 = arith.constant 0 : i32
    %c0_i32_0 = arith.constant 0 : i32
    %c0_i32_1 = arith.constant 0 : i32
    return %c0_i32, %c0_i32_0 : i32, i32
  }
}

</mosaic_0001>

<bundles_post_ra>
// kernel: tpu_custom_call.1
= control target key start
LH: loop header
LB: loop body
LE: loop exit
PB: predicated region body
PF: predicated region fallthrough
CT: control target
= control target key end

     0   :  { %6 = vsyncpa [#allocation3], 0  ;;  %s201_s0 = inlined_call_operand.hbm [shape: f32[8,128], index: 0, kind: input, shape index: {}]   ;;  %s202_s1 = inlined_call_operand.hbm [shape: f32[8,8], index: 1, kind: output, shape index: {}]  }
   0x1   :  { %7 = vsyncpa [#allocation4], 0  ;;  %s178_s6 = smov [#allocation2]  }
   0x2   :  { %s14_s7 = sshll.u32 %s178_s6, 4  ;;  %s15_s7 = int_to_ptr.vmem [resolvable:$true] %s14_s7 }
   0x3   :  { %s142_s8 = scalar_lea.vmem %s15_s7, 128  ;;  %p147_p1 = scmp.lt.s32.totalorder %s15_s7, %s15_s7 }
   0x4   :  { %p143_p0 = scmp.ne.s32.totalorder %s15_s7, %s142_s8  ;;  %p148_p2 = scmp.lt.s32.totalorder %s142_s8, %s142_s8 }
   0x6   :  { %p149_p3 = por %p148_p2, %p147_p1 }
   0x8   :  { %p150_p4 = pnand %p149_p3, %p143_p0 }
   0xa   :  { %153 = shalt.err (!%p150_p4)
}
   0xb   :  { %17 = dma.hbm_to_vmem [thread:$0]  %s201_s0, 128, %s15_s7, [#allocation3]  }
   0xc   :  { %174 = dma.done.wait [#allocation3], 128  }
   0xd   :  { %175 = vsyncadd [#allocation3], 4294967168  ;;  %vm25_vm0 = vcmask 64512   ;;  %v179_v0 = vmov 0.0   ;;  %vm180_vm1 = vmmov 0   ;;  %v27_v1 = vld [vmem:[#allocation2] sm:$0xff] }
   0xe   :  { %26 = vst.msk [vmem:[#allocation5] sm:$0xff] %vm25_vm0, %v179_v0  ;;  %125 = vmatprep.subr.mxu0 %v179_v0  ;;  %127 = vmatprep.mubr.msk.f32.mxu0 %vm180_vm1, %v179_v0  ;;  %s181_s11 = smov [#allocation5]  }
   0xf   :  { %126 = vmatpush3.xpose.msra.mxu0 %v27_v1  ;;  %s114_s0 = sshll.u32 %s181_s11, 4  ;;  %s115_s0 = int_to_ptr.vmem [resolvable:$true] %s114_s0 }
  0x10   :  { %s154_s12 = scalar_lea.vmem %s115_s0, 128  ;;  %p159_p6 = scmp.lt.s32.totalorder %s115_s0, %s115_s0 }
  0x11   :  { %p155_p5 = scmp.ne.s32.totalorder %s115_s0, %s154_s12  ;;  %p160_p7 = scmp.lt.s32.totalorder %s154_s12, %s154_s12 }
  0x12   :  { %128 = vmatmul.mubr.f32.vlgmr.msra.gmra.mxu0 %v27_v1 }
  0x13   :  { %p161_p8 = por %p160_p7, %p159_p6 }
  0x15   :  { %v28_v2 = vld [vmem:[#allocation5] sm:$0xff]  ;;  %p162_p9 = pnand %p161_p8, %p155_p5 }
  0xd2   :  { %v95_v3 = vpop.f32.mrf.mxu0 }
  0xd3   :  { %v99_v4 = vadd.f32 %v95_v3, %v28_v2 }
  0xd4   :  { %v129_v5 = vpop.f32.mrf.mxu0 }
  0xd5   :  { %101 = vst.msk [vmem:[#allocation5] sm:$0xff] %vm25_vm0, %v99_v4 }
  0xdc   :  { %v105_v6 = vld [vmem:[#allocation5] sm:$0xff] }
  0xdd   :  { %v106_v7 = vmul.f32 0.00390625, %v105_v6 }
  0xdf   :  { %107 = vst.msk [vmem:[#allocation5] sm:$0xff] %vm25_vm0, %v106_v7 }
  0xe0   :  { %165 = shalt.err (!%p162_p9)
}
  0xe1   :  { %117 = dma.vmem_to_hbm [thread:$0]  %s115_s0, 128, %s202_s1, [#allocation4]  }
  0xe2   :  { %176 = dma.done.wait [#allocation4], 128  }
  0xe3   :  { %177 = vsyncadd [#allocation4], 4294967168 }
  0xe4   :  { %121 = vsyncpa [#allocation3], 1 }
  0xe5   :  { %122 = vsyncpa [#allocation4], 1 }

</bundles_post_ra>
